<compile_context>
chip_gen: v7x
topology: tpu7x:2x2x1
jax: 0.10.0
libtpu: 0.0.40
codegen_flags: <defaults>
</compile_context>

<pallas_src>
import jax
import jax.numpy as jnp
from jax.experimental import pallas as pl
from jax.experimental.pallas import tpu as pltpu


# ---------------------------------------------------------------------------
# Kernel
# ---------------------------------------------------------------------------
def _fused_gru_cell(x_parts, h, w_i_parts, b_i, w_h, b_nh, H):
    """One myGRUCell with fused gate matmuls.

    gi = sum(x_p @ W_p) + b_i       # (1, 3H); b_r_h folded into r,z slots of b_i
    gh = h @ W_h                    # (1, 2H) = [r_layer_h(h)-bias | n_layer_h(h)-bias]
    r  = sigmoid(gi[:, 0H:1H] + gh[:, 0H:1H])
    z  = sigmoid(gi[:, 1H:2H] + gh[:, 0H:1H])       # torch code reuses r_layer_h here
    n  = tanh   (gi[:, 2H:3H] + r * (gh[:, 1H:2H] + b_nh))
    h' = (1 - z) * n + z * h
    """
    gi = b_i
    for xp, wp in zip(x_parts, w_i_parts):
        gi = gi + jnp.dot(xp, wp, preferred_element_type=jnp.float32)
    gh = jnp.dot(h, w_h, preferred_element_type=jnp.float32)

    rh = gh[:, :H]
    nh = gh[:, H:] + b_nh
    r = jax.nn.sigmoid(gi[:, :H] + rh)
    z = jax.nn.sigmoid(gi[:, H:2 * H] + rh)
    n = jnp.tanh(gi[:, 2 * H:] + r * nh)
    return (1.0 - z) * n + z * h


def decoder_kernel(
    y_ref, f_ref, h0_ref, h1_ref,
    # per-layer input weights (layer-0 weight split into y / features parts)
    w_iy0, w_if0, w_i1,
    # stacked per-layer params: b_i (2,3H), w_h (2,H,2H), b_nh (2,H)
    b_i_ref, w_h_ref, b_nh_ref,
    # outputs (aliased onto h0 / h1 inputs)
    h0_out, h1_out,
):
    H = h0_ref.shape[-1]
    h0 = h0_ref[...]
    h1 = h1_ref[...]

    y0 = _fused_gru_cell(
        (y_ref[...], f_ref[...]), h0,
        (w_iy0[...], w_if0[...]),
        b_i_ref[0:1, :], w_h_ref[0], b_nh_ref[0:1, :], H)
    y1 = _fused_gru_cell(
        (y0,), h1,
        (w_i1[...],),
        b_i_ref[1:2, :], w_h_ref[1], b_nh_ref[1:2, :], H)

    h0_out[...] = y0
    h1_out[...] = y1


# ---------------------------------------------------------------------------
# Parameters (deterministic, matching nn.Linear shapes, then packed)
# ---------------------------------------------------------------------------
def init_gru_params(key, inputs_size, hidden_size):
    """One myGRUCell. Returns dict of per-gate weights (in,out) + biases (1,H)."""
    names_i = ["r_i", "z_i", "n_i"]   # Linear(inputs_size, hidden_size)
    names_h = ["r_h", "n_h"]          # Linear(hidden_size, hidden_size); z_h unused
    params = {}
    keys = jax.random.split(key, 2 * (len(names_i) + len(names_h)))
    k = iter(keys)
    for name in names_i:
        w = jax.random.normal(next(k), (hidden_size, inputs_size), jnp.float32) * 0.1
        b = jax.random.normal(next(k), (hidden_size,), jnp.float32) * 0.1
        params["w_" + name] = w.T                        # (in, out)
        params["b_" + name] = b.reshape(1, hidden_size)  # (1, H)
    for name in names_h:
        w = jax.random.normal(next(k), (hidden_size, hidden_size), jnp.float32) * 0.1
        b = jax.random.normal(next(k), (hidden_size,), jnp.float32) * 0.1
        params["w_" + name] = w.T
        params["b_" + name] = b.reshape(1, hidden_size)
    return params


def _pack_gru_params(p):
    """Fuse per-gate linears: W_i (D_in,3H), b_i (1,3H) [b_r_h folded into r,z slots],
    W_h (H,2H), b_nh (1,H)."""
    w_i = jnp.concatenate([p["w_r_i"], p["w_z_i"], p["w_n_i"]], axis=1)
    b_i = jnp.concatenate(
        [p["b_r_i"] + p["b_r_h"], p["b_z_i"] + p["b_r_h"], p["b_n_i"]], axis=1)
    w_h = jnp.concatenate([p["w_r_h"], p["w_n_h"]], axis=1)
    b_nh = p["b_n_h"]
    return w_i, b_i, w_h, b_nh


def pack_decoder_params(layer_params, d_y):
    """Pack once at setup; reused every decode step (not on the hot path)."""
    w_i0, b_i0, w_h0, b_nh0 = _pack_gru_params(layer_params[0])
    w_i1, b_i1, w_h1, b_nh1 = _pack_gru_params(layer_params[1])
    # Split layer-0 input weight so the y_/features concat happens via the matmul.
    w_iy0, w_if0 = w_i0[:d_y], w_i0[d_y:]
    # Stack the shape-compatible per-layer params -> fewer kernel operands / DMAs.
    b_i = jnp.concatenate([b_i0, b_i1], axis=0)        # (2, 3H)
    w_h = jnp.stack([w_h0, w_h1], axis=0)              # (2, H, 2H)
    b_nh = jnp.concatenate([b_nh0, b_nh1], axis=0)     # (2, H)
    return (w_iy0, w_if0, w_i1, b_i, w_h, b_nh)


# ---------------------------------------------------------------------------
# Wrapper: reshape glue in plain JAX, hot path in one fused pallas_call
# ---------------------------------------------------------------------------
@jax.jit
def decoder_forward(y_, features, hiddens_down, packed_params):
    H = hiddens_down[0].shape[-1]
    y2 = y_.reshape(1, -1)
    f2 = features.reshape(1, -1)
    h0 = hiddens_down[0].reshape(1, H)
    h1 = hiddens_down[1].reshape(1, H)

    vmem = pl.BlockSpec(memory_space=pltpu.MemorySpace.VMEM)
    ins = (y2, f2, h0, h1) + tuple(packed_params)

    h0n, h1n = pl.pallas_call(
        decoder_kernel,
        out_shape=(
            jax.ShapeDtypeStruct((1, H), jnp.float32),
            jax.ShapeDtypeStruct((1, H), jnp.float32),
        ),
        in_specs=[vmem] * len(ins),
        out_specs=(vmem, vmem),
        input_output_aliases={2: 0, 3: 1},   # h0/h1 updated in place
    )(*ins)

    y_down = h1n  # layer-1 output == new top hidden (torch squeeze(dim=2) is a no-op)
    return y_down.reshape(1, 1, H), [h0n.reshape(1, 1, H), h1n.reshape(1, 1, H)]


# ---------------------------------------------------------------------------
# Pure-JAX reference (unfused, same math) for correctness check
# ---------------------------------------------------------------------------
def _gru_cell_ref(x, h, p):
    rh = jnp.dot(h, p["w_r_h"]) + p["b_r_h"]
    r = jax.nn.sigmoid(jnp.dot(x, p["w_r_i"]) + p["b_r_i"] + rh)
    z = jax.nn.sigmoid(jnp.dot(x, p["w_z_i"]) + p["b_z_i"] + rh)
    nh = jnp.dot(h, p["w_n_h"]) + p["b_n_h"]
    n = jnp.tanh(jnp.dot(x, p["w_n_i"]) + p["b_n_i"] + r * nh)
    return (1.0 - z) * n + z * h


def decoder_forward_ref(y_, features, hiddens_down, layer_params):
    H = hiddens_down[0].shape[-1]
    x = jnp.concatenate([y_, features], axis=2).reshape(1, -1)
    hs = [h.reshape(1, H) for h in hiddens_down]
    y = x
    new_hs = []
    for i, p in enumerate(layer_params):
        y = _gru_cell_ref(y, hs[i], p)
        new_hs.append(y)
    return y.reshape(1, 1, H), [h.reshape(1, 1, H) for h in new_hs]


# ---------------------------------------------------------------------------
if __name__ == "__main__":
    # Small, consistent shapes:
    #   y_ : (1, 1, 16), features : (1, 1, 16)  -> inputs_size = 32
    #   hidden_size = 32, num_layers = 2
    D_Y, D_F, HIDDEN = 16, 16, 32
    INPUTS_SIZE = D_Y + D_F

    key = jax.random.PRNGKey(0)
    k_y, k_f, k_l0, k_l1 = jax.random.split(key, 4)

    y_ = jax.random.normal(k_y, (1, 1, D_Y), jnp.float32)
    features = jax.random.normal(k_f, (1, 1, D_F), jnp.float32)
    hiddens_down = [jnp.zeros((1, 1, HIDDEN), jnp.float32) for _ in range(2)]  # init_hiddens()

    layer_params = [
        init_gru_params(k_l0, INPUTS_SIZE, HIDDEN),  # layer 0: inputs_size -> hidden
        init_gru_params(k_l1, HIDDEN, HIDDEN),       # layer 1: hidden -> hidden
    ]
    packed = pack_decoder_params(layer_params, d_y=D_Y)  # pack once, reuse per step

    y_down, new_hiddens = decoder_forward(y_, features, hiddens_down, packed)
    jax.block_until_ready(y_down)
    jax.block_until_ready(new_hiddens)

    y_ref, h_ref = decoder_forward_ref(y_, features, hiddens_down, layer_params)
    assert y_down.shape == (1, 1, HIDDEN)
    assert jnp.allclose(y_down, y_ref, atol=1e-5), "y_down mismatch vs reference"
    assert jnp.allclose(new_hiddens[0], h_ref[0], atol=1e-5), "hidden0 mismatch"
    assert jnp.allclose(new_hiddens[1], h_ref[1], atol=1e-5), "hidden1 mismatch"

    print("KERNEL_OK")
</pallas_src>

<mosaic_0001>
module attributes {stable_mosaic.version = 11 : i64} {
  func.func @decoder_kernel(%arg0: memref<1x16xf32, #tpu.memory_space<vmem>>, %arg1: memref<1x16xf32, #tpu.memory_space<vmem>>, %arg2: memref<1x32xf32, #tpu.memory_space<vmem>>, %arg3: memref<1x32xf32, #tpu.memory_space<vmem>>, %arg4: memref<16x96xf32, #tpu.memory_space<vmem>>, %arg5: memref<16x96xf32, #tpu.memory_space<vmem>>, %arg6: memref<32x96xf32, #tpu.memory_space<vmem>>, %arg7: memref<2x96xf32, #tpu.memory_space<vmem>>, %arg8: memref<2x32x64xf32, #tpu.memory_space<vmem>>, %arg9: memref<2x32xf32, #tpu.memory_space<vmem>>, %arg10: memref<1x32xf32, #tpu.memory_space<vmem>>, %arg11: memref<1x32xf32, #tpu.memory_space<vmem>>) attributes {dimension_semantics = [], scalar_prefetch = 0 : i64, scratch_operands = 0 : i64, tpu.core_type = #tpu.core_type<tc>} {
    %c0 = arith.constant 0 : index
    %c0_0 = arith.constant 0 : index
    %0 = vector.load %arg2[%c0, %c0_0] : memref<1x32xf32, #tpu.memory_space<vmem>>, vector<1x32xf32>
    %c0_1 = arith.constant 0 : index
    %c0_2 = arith.constant 0 : index
    %1 = vector.load %arg3[%c0_1, %c0_2] : memref<1x32xf32, #tpu.memory_space<vmem>>, vector<1x32xf32>
    %c0_3 = arith.constant 0 : index
    %c0_4 = arith.constant 0 : index
    %2 = vector.load %arg0[%c0_3, %c0_4] : memref<1x16xf32, #tpu.memory_space<vmem>>, vector<1x16xf32>
    %c0_5 = arith.constant 0 : index
    %c0_6 = arith.constant 0 : index
    %3 = vector.load %arg1[%c0_5, %c0_6] : memref<1x16xf32, #tpu.memory_space<vmem>>, vector<1x16xf32>
    %c0_7 = arith.constant 0 : index
    %c0_8 = arith.constant 0 : index
    %4 = vector.load %arg4[%c0_7, %c0_8] : memref<16x96xf32, #tpu.memory_space<vmem>>, vector<16x96xf32>
    %c0_9 = arith.constant 0 : index
    %c0_10 = arith.constant 0 : index
    %5 = vector.load %arg5[%c0_9, %c0_10] : memref<16x96xf32, #tpu.memory_space<vmem>>, vector<16x96xf32>
    %c0_11 = arith.constant 0 : index
    %c0_12 = arith.constant 0 : index
    %6 = vector.load %arg7[%c0_11, %c0_12] : memref<2x96xf32, #tpu.memory_space<vmem>>, vector<1x96xf32>
    %c0_13 = arith.constant 0 : index
    %c0_14 = arith.constant 0 : index
    %c0_15 = arith.constant 0 : index
    %7 = vector.load %arg8[%c0_13, %c0_14, %c0_15] : memref<2x32x64xf32, #tpu.memory_space<vmem>>, vector<1x32x64xf32>
    %8 = vector.shape_cast %7 : vector<1x32x64xf32> to vector<32x64xf32>
    %c0_16 = arith.constant 0 : index
    %c0_17 = arith.constant 0 : index
    %9 = vector.load %arg9[%c0_16, %c0_17] : memref<2x32xf32, #tpu.memory_space<vmem>>, vector<1x32xf32>
    %cst = arith.constant dense<0.000000e+00> : vector<1x96xf32>
    %10 = tpu.matmul %2, %4, %cst {dimension_numbers = #tpu.dot_dimension_numbers<[1], [0], [0], [1], [0, 0, 1, 1], [], []>} : vector<1x16xf32>, vector<16x96xf32>, vector<1x96xf32> -> vector<1x96xf32>
    %11 = arith.addf %6, %10 : vector<1x96xf32>
    %cst_18 = arith.constant dense<0.000000e+00> : vector<1x96xf32>
    %12 = tpu.matmul %3, %5, %cst_18 {dimension_numbers = #tpu.dot_dimension_numbers<[1], [0], [0], [1], [0, 0, 1, 1], [], []>} : vector<1x16xf32>, vector<16x96xf32>, vector<1x96xf32> -> vector<1x96xf32>
    %13 = arith.addf %11, %12 : vector<1x96xf32>
    %cst_19 = arith.constant dense<0.000000e+00> : vector<1x64xf32>
    %14 = tpu.matmul %0, %8, %cst_19 {dimension_numbers = #tpu.dot_dimension_numbers<[1], [0], [0], [1], [0, 0, 1, 1], [], []>} : vector<1x32xf32>, vector<32x64xf32>, vector<1x64xf32> -> vector<1x64xf32>
    %15 = vector.extract_strided_slice %14 {offsets = [0, 0], sizes = [1, 32], strides = [1, 1]} : vector<1x64xf32> to vector<1x32xf32>
    %16 = vector.extract_strided_slice %14 {offsets = [0, 32], sizes = [1, 32], strides = [1, 1]} : vector<1x64xf32> to vector<1x32xf32>
    %17 = arith.addf %16, %9 : vector<1x32xf32>
    %18 = vector.extract_strided_slice %13 {offsets = [0, 0], sizes = [1, 32], strides = [1, 1]} : vector<1x96xf32> to vector<1x32xf32>
    %19 = arith.addf %18, %15 : vector<1x32xf32>
    %20 = arith.negf %19 : vector<1x32xf32>
    %21 = math.exp %20 : vector<1x32xf32>
    %cst_20 = arith.constant 1.000000e+00 : f32
    %22 = vector.broadcast %cst_20 : f32 to vector<1x32xf32>
    %23 = arith.addf %22, %21 : vector<1x32xf32>
    %24 = arith.divf %22, %23 : vector<1x32xf32>
    %25 = vector.extract_strided_slice %13 {offsets = [0, 32], sizes = [1, 32], strides = [1, 1]} : vector<1x96xf32> to vector<1x32xf32>
    %26 = arith.addf %25, %15 : vector<1x32xf32>
    %27 = arith.negf %26 : vector<1x32xf32>
    %28 = math.exp %27 : vector<1x32xf32>
    %cst_21 = arith.constant 1.000000e+00 : f32
    %29 = vector.broadcast %cst_21 : f32 to vector<1x32xf32>
    %30 = arith.addf %29, %28 : vector<1x32xf32>
    %31 = arith.divf %29, %30 : vector<1x32xf32>
    %32 = vector.extract_strided_slice %13 {offsets = [0, 64], sizes = [1, 32], strides = [1, 1]} : vector<1x96xf32> to vector<1x32xf32>
    %33 = arith.mulf %24, %17 : vector<1x32xf32>
    %34 = arith.addf %32, %33 : vector<1x32xf32>
    %35 = math.tanh %34 : vector<1x32xf32>
    %cst_22 = arith.constant 1.000000e+00 : f32
    %36 = vector.broadcast %cst_22 : f32 to vector<1x32xf32>
    %37 = arith.subf %36, %31 : vector<1x32xf32>
    %38 = arith.mulf %37, %35 : vector<1x32xf32>
    %39 = arith.mulf %31, %0 : vector<1x32xf32>
    %40 = arith.addf %38, %39 : vector<1x32xf32>
    %c0_23 = arith.constant 0 : index
    %c0_24 = arith.constant 0 : index
    %41 = vector.load %arg6[%c0_23, %c0_24] : memref<32x96xf32, #tpu.memory_space<vmem>>, vector<32x96xf32>
    %c1 = arith.constant 1 : index
    %c0_25 = arith.constant 0 : index
    %42 = vector.load %arg7[%c1, %c0_25] : memref<2x96xf32, #tpu.memory_space<vmem>>, vector<1x96xf32>
    %c1_26 = arith.constant 1 : index
    %c0_27 = arith.constant 0 : index
    %c0_28 = arith.constant 0 : index
    %43 = vector.load %arg8[%c1_26, %c0_27, %c0_28] : memref<2x32x64xf32, #tpu.memory_space<vmem>>, vector<1x32x64xf32>
    %44 = vector.shape_cast %43 : vector<1x32x64xf32> to vector<32x64xf32>
    %c1_29 = arith.constant 1 : index
    %c0_30 = arith.constant 0 : index
    %45 = vector.load %arg9[%c1_29, %c0_30] : memref<2x32xf32, #tpu.memory_space<vmem>>, vector<1x32xf32>
    %cst_31 = arith.constant dense<0.000000e+00> : vector<1x96xf32>
    %46 = tpu.matmul %40, %41, %cst_31 {dimension_numbers = #tpu.dot_dimension_numbers<[1], [0], [0], [1], [0, 0, 1, 1], [], []>} : vector<1x32xf32>, vector<32x96xf32>, vector<1x96xf32> -> vector<1x96xf32>
    %47 = arith.addf %42, %46 : vector<1x96xf32>
    %cst_32 = arith.constant dense<0.000000e+00> : vector<1x64xf32>
    %48 = tpu.matmul %1, %44, %cst_32 {dimension_numbers = #tpu.dot_dimension_numbers<[1], [0], [0], [1], [0, 0, 1, 1], [], []>} : vector<1x32xf32>, vector<32x64xf32>, vector<1x64xf32> -> vector<1x64xf32>
    %49 = vector.extract_strided_slice %48 {offsets = [0, 0], sizes = [1, 32], strides = [1, 1]} : vector<1x64xf32> to vector<1x32xf32>
    %50 = vector.extract_strided_slice %48 {offsets = [0, 32], sizes = [1, 32], strides = [1, 1]} : vector<1x64xf32> to vector<1x32xf32>
    %51 = arith.addf %50, %45 : vector<1x32xf32>
    %52 = vector.extract_strided_slice %47 {offsets = [0, 0], sizes = [1, 32], strides = [1, 1]} : vector<1x96xf32> to vector<1x32xf32>
    %53 = arith.addf %52, %49 : vector<1x32xf32>
    %54 = arith.negf %53 : vector<1x32xf32>
    %55 = math.exp %54 : vector<1x32xf32>
    %cst_33 = arith.constant 1.000000e+00 : f32
    %56 = vector.broadcast %cst_33 : f32 to vector<1x32xf32>
    %57 = arith.addf %56, %55 : vector<1x32xf32>
    %58 = arith.divf %56, %57 : vector<1x32xf32>
    %59 = vector.extract_strided_slice %47 {offsets = [0, 32], sizes = [1, 32], strides = [1, 1]} : vector<1x96xf32> to vector<1x32xf32>
    %60 = arith.addf %59, %49 : vector<1x32xf32>
    %61 = arith.negf %60 : vector<1x32xf32>
    %62 = math.exp %61 : vector<1x32xf32>
    %cst_34 = arith.constant 1.000000e+00 : f32
    %63 = vector.broadcast %cst_34 : f32 to vector<1x32xf32>
    %64 = arith.addf %63, %62 : vector<1x32xf32>
    %65 = arith.divf %63, %64 : vector<1x32xf32>
    %66 = vector.extract_strided_slice %47 {offsets = [0, 64], sizes = [1, 32], strides = [1, 1]} : vector<1x96xf32> to vector<1x32xf32>
    %67 = arith.mulf %58, %51 : vector<1x32xf32>
    %68 = arith.addf %66, %67 : vector<1x32xf32>
    %69 = math.tanh %68 : vector<1x32xf32>
    %cst_35 = arith.constant 1.000000e+00 : f32
    %70 = vector.broadcast %cst_35 : f32 to vector<1x32xf32>
    %71 = arith.subf %70, %65 : vector<1x32xf32>
    %72 = arith.mulf %71, %69 : vector<1x32xf32>
    %73 = arith.mulf %65, %1 : vector<1x32xf32>
    %74 = arith.addf %72, %73 : vector<1x32xf32>
    %c0_36 = arith.constant 0 : index
    %c0_37 = arith.constant 0 : index
    %75 = vector.load %arg10[%c0_36, %c0_37] : memref<1x32xf32, #tpu.memory_space<vmem>>, vector<1x32xf32>
    tpu.vector_store %arg10[%c0_36, %c0_37], %40 {strides = array<i32>} : memref<1x32xf32, #tpu.memory_space<vmem>>, vector<1x32xf32>,
    %c0_38 = arith.constant 0 : index
    %c0_39 = arith.constant 0 : index
    %76 = vector.load %arg11[%c0_38, %c0_39] : memref<1x32xf32, #tpu.memory_space<vmem>>, vector<1x32xf32>
    tpu.vector_store %arg11[%c0_38, %c0_39], %74 {strides = array<i32>} : memref<1x32xf32, #tpu.memory_space<vmem>>, vector<1x32xf32>,
    return
  }
}

</mosaic_0001>

<bundles_post_ra>
// kernel: decoder_forward.1
= control target key start
LH: loop header
LB: loop body
LE: loop exit
PB: predicated region body
PF: predicated region fallthrough
CT: control target
= control target key end

     0   :  { %17 = vsyncpa [#allocation3], 0  ;;  %s1040_s0 = inlined_call_operand.vmem [shape: f32[1,16], index: 0, kind: input, shape index: {}]   ;;  %s1041_s1 = inlined_call_operand.vmem [shape: f32[1,16], index: 1, kind: input, shape index: {}]   ;;  %s1042_s2 = inlined_call_operand.vmem [shape: f32[1,32], index: 2, kind: input, shape index: {}, may-alias: {2,10}]   ;;  %s1043_s3 = inlined_call_operand.vmem [shape: f32[1,32], index: 3, kind: input, shape index: {}, may-alias: {3,11}]   ;;  %s1044_s4 = inlined_call_operand.hbm [shape: f32[16,96], index: 4, kind: input, shape index: {}]   ;;  %s1045_s5 = inlined_call_operand.hbm [shape: f32[16,96], index: 5, kind: input, shape index: {}]   ;;  %s1046_s6 = inlined_call_operand.vmem [shape: f32[32,96], index: 6, kind: input, shape index: {}]   ;;  %s1047_s7 = inlined_call_operand.vmem [shape: f32[2,96], index: 7, kind: input, shape index: {}]   ;;  %s1048_s8 = inlined_call_operand.hbm [shape: f32[2,32,64], index: 8, kind: input, shape index: {}]   ;;  %s1049_s9 = inlined_call_operand.hbm [shape: f32[2,32], index: 9, kind: input, shape index: {}]   ;;  %s1050_s10 = inlined_call_operand.vmem [shape: f32[1,32], index: 10, kind: output, shape index: {0}, may-alias: {2,10}]   ;;  %s1051_s11 = inlined_call_operand.vmem [shape: f32[1,32], index: 11, kind: output, shape index: {1}, may-alias: {3,11}]  }
   0x1   :  { %18 = vsyncpa [#allocation5], 0 }
   0x2   :  { %19 = vsyncpa [#allocation8], 0  ;;  %s834_s17 = smov [#allocation4]   ;;  %s835_s19 = smov [#allocation2]  }
   0x3   :  { %s45_s18 = sshll.u32 %s834_s17, 4  ;;  %s33_s20 = sshll.u32 %s835_s19, 4  ;;  %s46_s18 = int_to_ptr.vmem [resolvable:$true] %s45_s18  ;;  %s906_s20 = int_to_ptr.vmem [resolvable:$true] %s33_s20 }
   0x4   :  { %s740_s23 = scalar_lea.hbm %s1045_s5, 256 }
   0x5   :  { %p741_p0 = scmp.ne.s32.totalorder %s1045_s5, %s740_s23  ;;  %p744_p1 = scmp.lt.u32.totalorder %s740_s23, %s1045_s5 }
   0x7   :  { %p746_p2 = pnand %p744_p1, %p741_p0 }
   0x9   :  { %749 = shalt.err (!%p746_p2)
}
   0xa   :  { %s750_s28 = scalar_lea.vmem %s46_s18, 256  ;;  %p755_p4 = scmp.lt.s32.totalorder %s46_s18, %s46_s18 }
   0xb   :  { %p751_p3 = scmp.ne.s32.totalorder %s46_s18, %s750_s28  ;;  %p756_p5 = scmp.lt.s32.totalorder %s750_s28, %s750_s28 }
   0xd   :  { %p757_p6 = por %p756_p5, %p755_p4 }
   0xf   :  { %p758_p7 = pnand %p757_p6, %p751_p3 }
  0x11   :  { %761 = shalt.err (!%p758_p7)
}
  0x12   :  { %s836_s29 = smov 128   ;;  %s837_s30 = smov 8  }
  0x13   :  { %51 = dma.hbm_to_vmem [thread:$0]  %s1045_s5, 256, %s46_s18, [#allocation5], %s836_s29, %s836_s29, %s837_s30  }
  0x14   :  { %s762_s16 = scalar_lea.hbm %s1044_s4, 256 }
  0x15   :  { %p763_p8 = scmp.ne.s32.totalorder %s1044_s4, %s762_s16  ;;  %p766_p9 = scmp.lt.u32.totalorder %s762_s16, %s1044_s4 }
  0x17   :  { %p768_p10 = pnand %p766_p9, %p763_p8 }
  0x19   :  { %771 = shalt.err (!%p768_p10)
}
  0x1a   :  { %s772_s23 = scalar_lea.vmem %s906_s20, 256  ;;  %p777_p12 = scmp.lt.s32.totalorder %s906_s20, %s906_s20 }
  0x1b   :  { %p773_p11 = scmp.ne.s32.totalorder %s906_s20, %s772_s23  ;;  %p778_p13 = scmp.lt.s32.totalorder %s772_s23, %s772_s23 }
  0x1d   :  { %p779_p0 = por %p778_p13, %p777_p12 }
  0x1f   :  { %p780_p1 = pnand %p779_p0, %p773_p11 }
  0x21   :  { %783 = shalt.err (!%p780_p1)
}
  0x22   :  { %39 = dma.hbm_to_vmem [thread:$0]  %s1044_s4, 256, %s906_s20, [#allocation3], %s836_s29, %s836_s29, %s837_s30  }
  0x23   :  { %s838_s24 = smov [#allocation6]   ;;  %s839_s26 = smov [#allocation7]  }
  0x24   :  { %s61_s25 = sshll.u32 %s838_s24, 4  ;;  %s74_s27 = sshll.u32 %s839_s26, 4  ;;  %s62_s25 = int_to_ptr.vmem [resolvable:$true] %s61_s25  ;;  %s75_s27 = int_to_ptr.vmem [resolvable:$true] %s74_s27 }
  0x25   :  { %s784_s13 = scalar_lea.hbm %s1048_s8, 1024 }
  0x26   :  { %p785_p2 = scmp.ne.s32.totalorder %s1048_s8, %s784_s13  ;;  %p788_p3 = scmp.lt.u32.totalorder %s784_s13, %s1048_s8 }
  0x28   :  { %p790_p4 = pnand %p788_p3, %p785_p2 }
  0x2a   :  { %793 = shalt.err (!%p790_p4)
}
  0x2b   :  { %s794_s4 = scalar_lea.vmem %s62_s25, 1024  ;;  %p799_p6 = scmp.lt.s32.totalorder %s62_s25, %s62_s25 }
  0x2c   :  { %p795_p5 = scmp.ne.s32.totalorder %s62_s25, %s794_s4  ;;  %p800_p7 = scmp.lt.s32.totalorder %s794_s4, %s794_s4 }
  0x2e   :  { %p801_p8 = por %p800_p7, %p799_p6 }
  0x30   :  { %p802_p9 = pnand %p801_p8, %p795_p5 }
  0x32   :  { %805 = shalt.err (!%p802_p9)
}
  0x33   :  { %67 = dma.hbm_to_vmem [thread:$0]  %s1048_s8, 1024, %s62_s25, [#allocation5], %s836_s29, %s836_s29, %s837_s30  }
  0x34   :  { %s806_s23 = scalar_lea.hbm %s1049_s9, 32 }
  0x35   :  { %p807_p10 = scmp.ne.s32.totalorder %s1049_s9, %s806_s23  ;;  %p810_p11 = scmp.lt.u32.totalorder %s806_s23, %s1049_s9 }
  0x37   :  { %p812_p12 = pnand %p810_p11, %p807_p10 }
  0x39   :  { %815 = shalt.err (!%p812_p12)
}
  0x3a   :  { %s816_s28 = scalar_lea.vmem %s75_s27, 32  ;;  %p821_p0 = scmp.lt.s32.totalorder %s75_s27, %s75_s27 }
  0x3b   :  { %p817_p13 = scmp.ne.s32.totalorder %s75_s27, %s816_s28  ;;  %p822_p1 = scmp.lt.s32.totalorder %s816_s28, %s816_s28 }
  0x3d   :  { %p823_p2 = por %p822_p1, %p821_p0 }
  0x3f   :  { %p824_p3 = pnand %p823_p2, %p817_p13 }
  0x41   :  { %827 = shalt.err (!%p824_p3)
}
  0x42   :  { %77 = dma.hbm_to_vmem [thread:$0]  %s1049_s9, 32, %s75_s27, [#allocation8]  }
  0x43   :  { %828 = dma.done.wait [#allocation3], 256  }
  0x44   :  { %829 = vsyncadd [#allocation3], 4294967040 }
  0x45   :  { %830 = dma.done.wait [#allocation5], 1280  }
  0x46   :  { %831 = vsyncadd [#allocation5], 4294966016 }
  0x47   :  { %832 = dma.done.wait [#allocation8], 32  }
  0x48   :  { %833 = vsyncadd [#allocation8], 4294967264  ;;  %v840_v0 = vmov 0.0|0.0   ;;  %vm841_vm0 = vmmov 0   ;;  %v842_v1 = vmov 0.0   ;;  %v94_v2 = vld [vmem:[#allocation2] sm:$0xff]  ;;  %v367_v30 = vlaneseq }
  0x49   :  { %681 = vmatprep.subr.bf16.mxu0 %v840_v0  ;;  %687 = vmatprep.subr.bf16.mxu1 %v840_v0  ;;  %v95_v3 = vld [vmem:[#allocation2 + $0x8] sm:$0xff]  ;;  %v99_v4 = vld [vmem:[#allocation6] sm:$0xff]  ;;  %v101_v7 = vld [vmem:[#allocation6 + $0x10] sm:$0xff]  ;;  %vm104_vm1 = vcmask 130048   ;;  %s843_s25 = smov 32   ;;  %vm253_vm2 = vcmask 261120  }
  0x4a   :  { %638 = vmatprep.mubr.msk.f32.mxu0 %vm841_vm0, %v842_v1  ;;  %656 = vmatprep.mubr.msk.f32.mxu1 %vm841_vm0, %v842_v1  ;;  %v682_v5 = vpack.c.bf16 %v95_v3, %v94_v2  ;;  %v100_v6 = vld [vmem:[#allocation6 + $0x8] sm:$0xff]  ;;  %v102_v9 = vld [vmem:[#allocation6 + $0x18] sm:$0xff]  ;;  %v96_v10 = vld [vmem:[#allocation4] sm:$0xff]  ;;  %v368_v31 = vshrl.u32 %v367_v30, 7  ;;  %vm586_vm3 = vcmask 253952  }
  0x4b   :  { %v688_v8 = vpack.c.bf16 %v100_v6, %v99_v4  ;;  %v92_v11 = vld [vmem:[%s1040_s0] sm:$0x1]  ;;  %v97_v12 = vld [vmem:[#allocation4 + $0x8] sm:$0xff]  ;;  %v691_v14 = vpack.c.bf16 %v102_v9, %v101_v7  ;;  %v383_v38 = vld [vmem:[#allocation6 + $0x28] sm:$0xff] }
  0x4c   :  { %683 = vmatpush3.bf16.msra.mxu0 %v682_v5  ;;  %v103_v13 = vld [vmem:[#allocation7] sm:$0x1]  ;;  %v685_v15 = vpack.c.bf16 %v97_v12, %v96_v10  ;;  %v369_v35 = vsub.s32 0, %v368_v31  ;;  %v384_v39 = vld [vmem:[#allocation6 + $0x30] sm:$0xff]  ;;  %v385_v41 = vld [vmem:[#allocation6 + $0x38] sm:$0xff] }
  0x4d   :  { %689 = vmatpush3.bf16.msra.mxu1 %v688_v8  ;;  %684 = vmatprep.subr.bf16.mxu0 %v840_v0  ;;  %v90_v16 = vld [vmem:[%s1042_s2] sm:$0x1]  ;;  %s844_s2 = smov 96   ;;  %v703_v42 = vpack.c.bf16 %v385_v41, %v384_v39  ;;  %v386_v46 = vld [vmem:[#allocation7 + $0x1] sm:$0x1]  ;;  %v377_v48 = vld [vmem:[%s1046_s6 + $0x8] sm:$0xff] }
  0x4e   :  { %690 = vmatprep.subr.bf16.mxu1 %v840_v0  ;;  %328 = vrot.lane.b32.xlu0 %v103_v13, %s843_s25  ;;  %v93_v17 = vld [vmem:[%s1041_s1] sm:$0x1]  ;;  %s845_s1 = smov 64   ;;  %v370_v36 = vrot.slane %v90_v16, %v369_v35  ;;  %v378_v50 = vld [vmem:[%s1046_s6 + $0x10] sm:$0xff]  ;;  %v379_v51 = vld [vmem:[%s1046_s6 + $0x18] sm:$0xff] }
  0x4f   :  { %639 = vmatmul.mubr.msk.f32.vlgmr.msra.gmra.mrb[0].mxu0 %vm104_vm1, %v92_v11  ;;  %v98_v24 = vld [vmem:[%s1047_s7] sm:$0x1]  ;;  %v697_v52 = vpack.c.bf16 %v379_v51, %v378_v50  ;;  %v380_v8 = vld [vmem:[%s1047_s7 + $0x1] sm:$0x1] }
  0x50   :  { %686 = vmatpush3.bf16.msra.mxu0 %v685_v15  ;;  %645 = vmatprep.mubr.msk.f32.mxu0 %vm841_vm0, %v842_v1  ;;  %v382_v37 = vld [vmem:[#allocation6 + $0x20] sm:$0xff] }
  0x51   :  { %692 = vmatpush3.bf16.msra.mxu1 %v691_v14  ;;  %693 = vmatprep.subr.bf16.mxu0 %v840_v0  ;;  %v700_v40 = vpack.c.bf16 %v383_v38, %v382_v37  ;;  %v91_v44 = vld [vmem:[%s1043_s3] sm:$0x1] }
  0x52   :  { %699 = vmatprep.subr.bf16.mxu1 %v840_v0  ;;  %v376_v47 = vld [vmem:[%s1046_s6] sm:$0xff]  ;;  %v579_v6 = vrot.slane %v91_v44, %v369_v35 }
  0x53   :  { %v694_v49 = vpack.c.bf16 %v377_v48, %v376_v47 }
  0x54   :  { %657 = vmatmul.mubr.msk.f32.vlgmr.msra.gmra.mrb[0].mxu1 %vm253_vm2, %v90_v16 }
  0x55   :  { %678 = vmatprep.mubr.msk.f32.mxu1 %vm841_vm0, %v842_v1  ;;  %701 = vmatpush3.bf16.msra.mxu1 %v700_v40 }
  0x56   :  { %702 = vmatprep.subr.bf16.mxu1 %v840_v0 }
  0x57   :  { %646 = vmatmul.mubr.msk.f32.vlgmr.msra.gmra.mrb[0].mxu0 %vm104_vm1, %v93_v17 }
  0x58   :  { %667 = vmatprep.mubr.msk.f32.mxu0 %vm841_vm0, %v842_v1  ;;  %695 = vmatpush3.bf16.msra.mxu0 %v694_v49 }
  0x59   :  { %704 = vmatpush3.bf16.msra.mxu1 %v703_v42  ;;  %696 = vmatprep.subr.bf16.mxu0 %v840_v0 }
  0x5c   :  { %679 = vmatmul.mubr.msk.f32.vlgmr.msra.gmra.mrb[2].mxu1 %vm253_vm2, %v91_v44  ;;  %698 = vmatpush3.bf16.msra.mxu0 %v697_v52 }
  0xc0   :  { %v329_v18 = vpop.permute.xlu0 %328 }
 0x127   :  { %v323_v19 = vpop.f32.mrb[0].mxu1 }
 0x128   :  { %v331_v20 = vadd.f32 %v329_v18, %v323_v19  ;;  %v658_v21 = vpop.f32.mrb[1].mxu1 }
 0x12a   :  { %351 = vrot.lane.b32.xlu0 %v331_v20, %s844_s2  ;;  %v248_v22 = vpop.f32.mrb[0].mxu0 }
 0x12b   :  { %v647_v23 = vpop.f32.mrb[1].mxu0  ;;  %v705_v25 = vadd.f32 %v248_v22, %v98_v24 }
 0x12d   :  { %v332_v26 = vadd.f32 %v705_v25, %v323_v19 }
 0x12f   :  { %v607_v27 = vmul.f32 -1.442695, %v332_v26  ;;  %v532_v3 = vpop.f32.mrb[2].mxu1 }
 0x130   :  { %v680_v5 = vpop.f32.mrb[3].mxu1 }
 0x131   :  { %720 = vpow2.f32 %v607_v27 }
 0x13b   :  { %v721_v28 = vpop.eup %720 }
 0x13c   :  { %v336_v29 = vadd.f32 1.0, %v721_v28 }
 0x13e   :  { %722 = vrcp.f32 %v336_v29 }
 0x148   :  { %v723_v32 = vpop.eup %722 }
 0x19c   :  { %v352_v33 = vpop.permute.xlu0 %351 }
 0x19d   :  { %v354_v34 = vmul.f32 %v723_v32, %v352_v33 }
 0x19f   :  { %356 = vrot.lane.b32.xlu1 %v354_v34, %s845_s1 }
 0x1a3   :  { %340 = vrot.lane.b32.xlu1 %v323_v19, %s843_s25 }
 0x1a7   :  { %371 = vrot.lane.b32.xlu1 %v370_v36, %s843_s25 }
 0x1ab   :  { %537 = vrot.lane.b32.xlu1 %v386_v46, %s843_s25 }
 0x211   :  { %v357_v43 = vpop.permute.xlu1 %356 }
 0x212   :  { %v359_v45 = vadd.f32 %v705_v25, %v357_v43 }
 0x214   :  { %724 = vtanh.f32 %v359_v45 }
 0x215   :  { %v341_v54 = vpop.permute.xlu1 %340 }
 0x216   :  { %v343_v55 = vadd.f32 %v705_v25, %v341_v54 }
 0x218   :  { %v608_v56 = vmul.f32 -1.442695, %v343_v55 }
 0x219   :  { %v372_v60 = vpop.permute.xlu1 %371 }
 0x21a   :  { %726 = vpow2.f32 %v608_v56 }
 0x21d   :  { %v538_v0 = vpop.permute.xlu1 %537 }
 0x21e   :  { %v725_v53 = vpop.eup %724  ;;  %v540_v4 = vadd.f32 %v538_v0, %v532_v3 }
 0x21f   :  { %363 = vrot.lane.b32.xlu0 %v725_v53, %s844_s2 }
 0x224   :  { %v727_v57 = vpop.eup %726 }
 0x225   :  { %v347_v58 = vadd.f32 1.0, %v727_v57 }
 0x227   :  { %728 = vrcp.f32 %v347_v58 }
 0x231   :  { %v729_v59 = vpop.eup %728 }
 0x232   :  { %v361_v61 = vsub.f32 1.0, %v729_v59  ;;  %v374_v63 = vmul.f32 %v729_v59, %v372_v60 }
 0x291   :  { %v364_v62 = vpop.permute.xlu0 %363 }
 0x292   :  { %v366_v1 = vmul.f32 %v364_v62, %v361_v61 }
 0x294   :  { %v375_v2 = vadd.f32 %v374_v63, %v366_v1 }
 0x296   :  { %388 = vrot.lane.b32.xlu0 %v375_v2, %s844_s2 }
 0x29a   :  { %560 = vrot.lane.b32.xlu0 %v540_v4, %s844_s2 }
 0x29e   :  { %549 = vrot.lane.b32.xlu0 %v532_v3, %s843_s25 }
 0x2a2   :  { %580 = vrot.lane.b32.xlu0 %v579_v6, %s843_s25 }
 0x308   :  { %v389_v7 = vpop.permute.xlu0 %388 }
 0x309   :  { %587 = vst.msk [vmem:[%s1050_s10] sm:$0x1] %vm586_vm3, %v389_v7  ;;  %668 = vmatmul.mubr.msk.f32.vlgmr.msra.gmra.mrb[2].mxu0 %vm253_vm2, %v389_v7 }
 0x30c   :  { %v561_v17 = vpop.permute.xlu0 %560 }
 0x310   :  { %v550_v22 = vpop.permute.xlu0 %549 }
 0x314   :  { %v581_v28 = vpop.permute.xlu0 %580 }
 0x3dc   :  { %v458_v9 = vpop.f32.mrb[2].mxu0 }
 0x3dd   :  { %v462_v10 = vadd.f32 %v458_v9, %v380_v8  ;;  %v669_v11 = vpop.f32.mrb[3].mxu0 }
 0x3df   :  { %v541_v12 = vadd.f32 %v532_v3, %v462_v10  ;;  %v552_v23 = vadd.f32 %v550_v22, %v462_v10 }
 0x3e1   :  { %v611_v13 = vmul.f32 -1.442695, %v541_v12  ;;  %v612_v24 = vmul.f32 -1.442695, %v552_v23 }
 0x3e3   :  { %730 = vpow2.f32 %v611_v13 }
 0x3ed   :  { %v731_v14 = vpop.eup %730 }
 0x3ee   :  { %v545_v15 = vadd.f32 1.0, %v731_v14 }
 0x3f0   :  { %732 = vrcp.f32 %v545_v15 }
 0x3fa   :  { %v733_v16 = vpop.eup %732 }
 0x3fb   :  { %v563_v18 = vmul.f32 %v733_v16, %v561_v17 }
 0x3fd   :  { %565 = vrot.lane.b32.xlu1 %v563_v18, %s845_s1 }
 0x46f   :  { %v566_v19 = vpop.permute.xlu1 %565 }
 0x470   :  { %v568_v20 = vadd.f32 %v566_v19, %v462_v10 }
 0x472   :  { %734 = vtanh.f32 %v568_v20 }
 0x473   :  { %736 = vpow2.f32 %v612_v24 }
 0x47c   :  { %v735_v21 = vpop.eup %734 }
 0x47d   :  { %572 = vrot.lane.b32.xlu1 %v735_v21, %s844_s2  ;;  %v737_v25 = vpop.eup %736 }
 0x47e   :  { %v556_v26 = vadd.f32 1.0, %v737_v25 }
 0x480   :  { %738 = vrcp.f32 %v556_v26 }
 0x48a   :  { %v739_v27 = vpop.eup %738 }
 0x48b   :  { %v570_v29 = vsub.f32 1.0, %v739_v27  ;;  %v583_v31 = vmul.f32 %v739_v27, %v581_v28 }
 0x4ef   :  { %v573_v30 = vpop.permute.xlu1 %572 }
 0x4f0   :  { %v575_v32 = vmul.f32 %v573_v30, %v570_v29 }
 0x4f2   :  { %v584_v33 = vadd.f32 %v583_v31, %v575_v32 }
 0x4f4   :  { %589 = vrot.lane.b32.xlu1 %v584_v33, %s844_s2 }
 0x566   :  { %v590_v34 = vpop.permute.xlu1 %589 }
 0x567   :  { %592 = vst.msk [vmem:[%s1051_s11] sm:$0x1] %vm586_vm3, %v590_v34 }
 0x568   :  { %601 = vsyncpa [#allocation3], 1 }
 0x569   :  { %602 = vsyncpa [#allocation5], 1 }
 0x56a   :  { %603 = vsyncpa [#allocation8], 1 }

</bundles_post_ra>
